<compile_context>
chip_gen: v5e
topology: v5e:2x2
jax: 0.10.0
libtpu: 0.0.40
codegen_flags: <defaults>
</compile_context>

<pallas_src>
import functools

import jax
import jax.numpy as jnp
from jax.experimental import pallas as pl
from jax.experimental.pallas import tpu as pltpu


def _vmem_limit_bytes():
    """Generation-aware VMEM limit (~3/4 of physical capacity)."""
    try:
        cap = int(pltpu.get_tpu_info().vmem_capacity_bytes)
    except Exception:
        cap = 64 * 1024 * 1024          # conservative (v7x-sized) fallback
    return max(32 * 1024 * 1024, min((cap * 3) // 4, 96 * 1024 * 1024))


def _pad_to_multiple(x, ps):
    # Mirrors the module's F.pad on the right/bottom with zeros.
    _, _, H, W = x.shape
    pad_h = (-H) % ps
    pad_w = (-W) % ps
    if pad_h or pad_w:
        x = jnp.pad(x, ((0, 0), (0, 0), (0, pad_h), (0, pad_w)))
    return x


# ----------------------------------------------------------------------------
# pool kernel: 0.5 * (MaxPool2d + AvgPool2d), kernel = stride = patch_size
# ----------------------------------------------------------------------------
def _pool_kernel(x_ref, pm_ref, wid_ref, o_ref, *, ps, wp):
    """x_ref:(TB,K) flat (h,w) data of GH pooled rows, K = GH*ps*wp.
       pm_ref:(K,NO) bf16 0/1 pooling matrix (one 1 per row), NO = GH*Wo.
       wid_ref:(1,K) f32 window id of every flat position.  o_ref:(TB,NO)."""
    x = x_ref[...].astype(jnp.float32)
    wid = wid_ref[...]
    size = x.shape[-1]

    def tree(v, stride, op):
        # combines lanes {c + s*(a + b*wp) : a,b in [0,ps)} into lane c
        # (s = +-1 depending on the hardware roll convention).
        covered = 1
        while covered < ps:
            step = min(covered, ps - covered)
            v = op(v, pltpu.roll(v, (size - step * stride) % size, axis=1))
            covered += step
        return v

    def tree2(v, op):
        return tree(tree(v, 1, op), wp, op)

    m = tree2(x, jnp.maximum)           # window max lands on one lane / window
    # Detect that lane by pushing window ids through the *same* shifts: a lane
    # whose aggregated ids are all equal aggregated exactly its own window, so
    # the result is independent of the roll direction.
    same = tree2(wid, jnp.maximum) == tree2(wid, jnp.minimum)
    collect = same.astype(jnp.float32) * float(ps * ps)        # (1, K)

    # Summed per window by the 0/1 pooling matrix, y gives ps^2*max + sum(x);
    # the final 0.5/ps^2 scale turns that into 0.5*(max + avg).
    y = m * collect + x

    # Exact two-pass bf16 hi/lo split -> native-rate MXU, f32 accumulation
    # (error ~2^-17 relative, well inside the fp32 reference tolerance).
    y_hi = y.astype(jnp.bfloat16)
    y_lo = (y - y_hi.astype(jnp.float32)).astype(jnp.bfloat16)
    pm = pm_ref[...]
    acc = jnp.dot(y_hi, pm, preferred_element_type=jnp.float32)
    acc = acc + jnp.dot(y_lo, pm, preferred_element_type=jnp.float32)
    o_ref[...] = (acc * (0.5 / (ps * ps))).astype(o_ref.dtype)


def _pool_constants(ps, wp, wo, gh):
    K = gh * ps * wp
    NO = gh * wo
    idx = jnp.arange(K, dtype=jnp.int32)
    wid = (idx // (ps * wp)) * wo + (idx % wp) // ps           # window id per lane
    pm = wid[:, None] == jnp.arange(NO, dtype=jnp.int32)[None, :]
    return pm.astype(jnp.bfloat16), wid.astype(jnp.float32).reshape(1, K)


@functools.partial(jax.jit, static_argnames=("patch_size",))
def patch_embed_pool(x, patch_size=4):
    """proj_type='pool': 0.5 * (MaxPool + AvgPool), kernel=stride=patch_size."""
    ps = patch_size
    x = _pad_to_multiple(x, ps)
    N, C, Hp, Wp = x.shape
    Ho, Wo = Hp // ps, Wp // ps
    B = N * C

    # GH pooled rows per block: smallest divisor of Ho whose output block is a
    # multiple of 128 lanes; fall back to the full height (block dims equal to
    # the full array dims are always legal).
    GH = Ho
    for g in range(1, Ho + 1):
        if Ho % g == 0 and (g * Wo) % 128 == 0:
            GH = g
            break
    K = GH * ps * Wp
    NO = GH * Wo

    # ~2 MiB f32 input blocks: amortizes the ~0.35us/step overhead on every
    # generation while leaving plenty of VMEM headroom (v7x: 64 MiB physical).
    rows = (2 * 1024 * 1024) // (K * 4)
    TB = B if rows >= B else min(B, max(8, (rows // 8) * 8))
    grid = (pl.cdiv(B, TB), Ho // GH)
    # TODO(synk): for pathologically wide rows (K*4 >> 2 MiB with no suitable
    # divisor of Ho) the block should additionally be split along W (3-D blocks),
    # and on v5e the lane dimension could be sub-chunked to keep temps in vregs.

    pm, wid = _pool_constants(ps, Wp, Wo, GH)
    x2 = x.reshape(B, Hp * Wp)          # free view, no HBM relayout pass

    out = pl.pallas_call(
        functools.partial(_pool_kernel, ps=ps, wp=Wp),
        out_shape=jax.ShapeDtypeStruct((B, Ho * Wo), x.dtype),
        grid_spec=pltpu.PrefetchScalarGridSpec(
            num_scalar_prefetch=0,
            grid=grid,
            in_specs=[
                pl.BlockSpec((TB, K), lambda i, j: (i, j)),
                pl.BlockSpec((K, NO), lambda i, j: (0, 0)),
                pl.BlockSpec((1, K), lambda i, j: (0, 0)),
            ],
            out_specs=pl.BlockSpec((TB, NO), lambda i, j: (i, j)),
        ),
        compiler_params=pltpu.CompilerParams(
            dimension_semantics=("parallel", "parallel"),
            vmem_limit_bytes=_vmem_limit_bytes()),
    )(x2, pm, wid)

    # (B, Ho*Wo) is already NCHW order -> free reshape, no transpose.
    return out.reshape(N, C, Ho, Wo)


# ----------------------------------------------------------------------------
# conv kernel: Conv2d(in_chans, embed_dim, kernel=stride=patch_size)
# ----------------------------------------------------------------------------
def _conv_kernel(x_ref, w_ref, b_ref, o_ref, acc_ref):
    """One (Ep, TM) tile of  weight @ im2col(x) + bias, K-tiled with an f32
    accumulator.  The tile is produced E-major so the output is NCHW directly."""
    k = pl.program_id(2)

    @pl.when(k == 0)
    def _():
        acc_ref[...] = jnp.zeros_like(acc_ref)

    acc_ref[...] += jax.lax.dot_general(
        w_ref[...], x_ref[...],
        dimension_numbers=(((1,), (0,)), ((), ())),
        preferred_element_type=jnp.float32,
        precision=jax.lax.Precision.HIGHEST)   # f32 fidelity; conv is mem-bound

    @pl.when(k == pl.num_programs(2) - 1)
    def _():
        o_ref[...] = (acc_ref[...] + b_ref[...]).astype(o_ref.dtype)


@functools.partial(jax.jit, static_argnames=("patch_size",))
def patch_embed_conv(x, weight, bias, patch_size=4):
    """proj_type='conv': Conv2d(in_chans, embed_dim, k=ps, stride=ps), NCHW out."""
    ps = patch_size
    x = _pad_to_multiple(x, ps)
    N, C, Hp, Wp = x.shape
    Ho, Wo = Hp // ps, Wp // ps
    HW = Ho * Wo
    E = weight.shape[0]
    K = C * ps * ps

    Ep = max(8, ((E + 7) // 8) * 8)              # sublane-dense E rows
    if K <= 1024:                                # small resident weight
        Kp = ((K + 7) // 8) * 8
        TK = Kp
    else:                                        # K-tiled accumulation (v7x-safe)
        TK = 1024
        Kp = ((K + TK - 1) // TK) * TK
    TM = HW if HW <= 512 else 512                # lane-dense output tiles

    # im2col (single relayout pass), kept in f32 to match torch Conv2d numerics.
    xc = x.reshape(N, C, Ho, ps, Wo, ps)
    xc = jnp.transpose(xc, (0, 1, 3, 5, 2, 4)).reshape(N, K, HW)
    xc = xc.astype(jnp.float32)
    if Kp != K:
        xc = jnp.pad(xc, ((0, 0), (0, Kp - K), (0, 0)))
    wm = jnp.pad(weight.reshape(E, K).astype(jnp.float32),
                 ((0, Ep - E), (0, Kp - K)))
    bm = jnp.pad(bias.astype(jnp.float32), (0, Ep - E)).reshape(Ep, 1)
    # TODO(synk): for very small E/C the im2col itself could be fused into the
    # kernel with a BlockSpec over the natural NCHW input.

    grid = (N, pl.cdiv(HW, TM), Kp // TK)
    out = pl.pallas_call(
        _conv_kernel,
        out_shape=jax.ShapeDtypeStruct((N, Ep, HW), x.dtype),
        grid_spec=pltpu.PrefetchScalarGridSpec(
            num_scalar_prefetch=0,
            grid=grid,
            in_specs=[
                pl.BlockSpec((None, TK, TM), lambda n, m, k: (n, k, m)),
                pl.BlockSpec((Ep, TK), lambda n, m, k: (0, k)),
                pl.BlockSpec((Ep, 1), lambda n, m, k: (0, 0)),
            ],
            out_specs=pl.BlockSpec((None, Ep, TM), lambda n, m, k: (n, 0, m)),
            scratch_shapes=[pltpu.VMEM((Ep, TM), jnp.float32)],
        ),
        compiler_params=pltpu.CompilerParams(
            dimension_semantics=("parallel", "parallel", "arbitrary"),
            vmem_limit_bytes=_vmem_limit_bytes()),
    )(xc, wm, bm)

    out = out.reshape(N, Ep, Ho, Wo)             # already NCHW
    if Ep != E:
        out = out[:, :E]
    return out


# TODO(synk): optional norm_layer (LayerNorm over embed_dim) is None in the
# default module config and is therefore not implemented here.


# ----------------------------------------------------------------------------
# Pure-JAX references for verification
# ----------------------------------------------------------------------------
def _ref_pool(x, ps):
    x = _pad_to_multiple(x, ps)
    N, C, Hp, Wp = x.shape
    xr = x.reshape(N, C, Hp // ps, ps, Wp // ps, ps)
    return 0.5 * (jnp.max(xr, axis=(3, 5)) + jnp.mean(xr, axis=(3, 5)))


def _ref_conv(x, w, b, ps):
    xp = _pad_to_multiple(x, ps)
    out = jax.lax.conv_general_dilated(
        xp, w, window_strides=(ps, ps), padding="VALID",
        dimension_numbers=("NCHW", "OIHW", "NCHW"),
        precision=jax.lax.Precision.HIGHEST,
        preferred_element_type=jnp.float32)
    return (out + b.reshape(1, -1, 1, 1)).astype(x.dtype)


# ----------------------------------------------------------------------------
# Main
# ----------------------------------------------------------------------------
if __name__ == "__main__":
    key = jax.random.PRNGKey(0)
    k_x, k_w, k_b = jax.random.split(key, 3)

    N, C, H, W = 2, 4, 16, 16
    patch_size = 4
    embed_dim = 32

    x = jax.random.normal(k_x, (N, C, H, W), dtype=jnp.float32)

    # Default module config: proj_type='pool' (no parameters).
    out_pool = jax.block_until_ready(patch_embed_pool(x, patch_size=patch_size))
    ref_pool = _ref_pool(x, patch_size)
    assert out_pool.shape == (N, C, H // patch_size, W // patch_size)
    assert jnp.allclose(out_pool, ref_pool, atol=1e-4, rtol=1e-4), (
        float(jnp.max(jnp.abs(out_pool - ref_pool))))

    # 'conv' variant: deterministic synthetic Conv2d weights.
    w = jax.random.normal(k_w, (embed_dim, C, patch_size, patch_size),
                          dtype=jnp.float32) * 0.02
    b = jax.random.normal(k_b, (embed_dim,), dtype=jnp.float32) * 0.02
    out_conv = jax.block_until_ready(
        patch_embed_conv(x, w, b, patch_size=patch_size))
    ref_conv = _ref_conv(x, w, b, patch_size)
    assert out_conv.shape == (N, embed_dim, H // patch_size, W // patch_size)
    assert jnp.allclose(out_conv, ref_conv, atol=1e-4, rtol=1e-4), (
        float(jnp.max(jnp.abs(out_conv - ref_conv))))

    print("KERNEL_OK")
</pallas_src>

<mosaic_0001>
module attributes {stable_mosaic.version = 11 : i64} {
  func.func @_pool_kernel(%arg0: i32, %arg1: i32, %arg2: memref<8x256xf32, #tpu.memory_space<vmem>>, %arg3: memref<256x16xbf16, #tpu.memory_space<vmem>>, %arg4: memref<1x256xf32, #tpu.memory_space<vmem>>, %arg5: memref<8x16xf32, #tpu.memory_space<vmem>>) attributes {dimension_semantics = [#tpu.dimension_semantics<parallel>, #tpu.dimension_semantics<parallel>], iteration_bounds = array<i64: 1, 1>, scalar_prefetch = 0 : i64, scratch_operands = 0 : i64, tpu.core_type = #tpu.core_type<tc>, window_params = [{transform_indices = @transform_0, window_bounds = array<i64: 8, 256>}, {pipeline_mode = #tpu.pipeline_mode<synchronous>, transform_indices = @transform_1, window_bounds = array<i64: 256, 16>}, {pipeline_mode = #tpu.pipeline_mode<synchronous>, transform_indices = @transform_2, window_bounds = array<i64: 1, 256>}, {transform_indices = @transform_3, window_bounds = array<i64: 8, 16>}]} {
    %c0 = arith.constant 0 : index
    %c0_0 = arith.constant 0 : index
    %0 = vector.load %arg2[%c0, %c0_0] : memref<8x256xf32, #tpu.memory_space<vmem>>, vector<8x256xf32>
    %c0_1 = arith.constant 0 : index
    %c0_2 = arith.constant 0 : index
    %1 = vector.load %arg4[%c0_1, %c0_2] : memref<1x256xf32, #tpu.memory_space<vmem>>, vector<1x256xf32>
    %c255_i32 = arith.constant 255 : i32
    %2 = tpu.dynamic_rotate %0 by %c255_i32 dim 1 : vector<8x256xf32>, i32 -> vector<8x256xf32>
    %3 = arith.maximumf %0, %2 : vector<8x256xf32>
    %c254_i32 = arith.constant 254 : i32
    %4 = tpu.dynamic_rotate %3 by %c254_i32 dim 1 : vector<8x256xf32>, i32 -> vector<8x256xf32>
    %5 = arith.maximumf %3, %4 : vector<8x256xf32>
    %c240_i32 = arith.constant 240 : i32
    %6 = tpu.dynamic_rotate %5 by %c240_i32 dim 1 : vector<8x256xf32>, i32 -> vector<8x256xf32>
    %7 = arith.maximumf %5, %6 : vector<8x256xf32>
    %c224_i32 = arith.constant 224 : i32
    %8 = tpu.dynamic_rotate %7 by %c224_i32 dim 1 : vector<8x256xf32>, i32 -> vector<8x256xf32>
    %9 = arith.maximumf %7, %8 : vector<8x256xf32>
    %c255_i32_3 = arith.constant 255 : i32
    %10 = tpu.dynamic_rotate %1 by %c255_i32_3 dim 1 : vector<1x256xf32>, i32 -> vector<1x256xf32>
    %11 = arith.maximumf %1, %10 : vector<1x256xf32>
    %c254_i32_4 = arith.constant 254 : i32
    %12 = tpu.dynamic_rotate %11 by %c254_i32_4 dim 1 : vector<1x256xf32>, i32 -> vector<1x256xf32>
    %13 = arith.maximumf %11, %12 : vector<1x256xf32>
    %c240_i32_5 = arith.constant 240 : i32
    %14 = tpu.dynamic_rotate %13 by %c240_i32_5 dim 1 : vector<1x256xf32>, i32 -> vector<1x256xf32>
    %15 = arith.maximumf %13, %14 : vector<1x256xf32>
    %c224_i32_6 = arith.constant 224 : i32
    %16 = tpu.dynamic_rotate %15 by %c224_i32_6 dim 1 : vector<1x256xf32>, i32 -> vector<1x256xf32>
    %17 = arith.maximumf %15, %16 : vector<1x256xf32>
    %c255_i32_7 = arith.constant 255 : i32
    %18 = tpu.dynamic_rotate %1 by %c255_i32_7 dim 1 : vector<1x256xf32>, i32 -> vector<1x256xf32>
    %19 = arith.minimumf %1, %18 : vector<1x256xf32>
    %c254_i32_8 = arith.constant 254 : i32
    %20 = tpu.dynamic_rotate %19 by %c254_i32_8 dim 1 : vector<1x256xf32>, i32 -> vector<1x256xf32>
    %21 = arith.minimumf %19, %20 : vector<1x256xf32>
    %c240_i32_9 = arith.constant 240 : i32
    %22 = tpu.dynamic_rotate %21 by %c240_i32_9 dim 1 : vector<1x256xf32>, i32 -> vector<1x256xf32>
    %23 = arith.minimumf %21, %22 : vector<1x256xf32>
    %c224_i32_10 = arith.constant 224 : i32
    %24 = tpu.dynamic_rotate %23 by %c224_i32_10 dim 1 : vector<1x256xf32>, i32 -> vector<1x256xf32>
    %25 = arith.minimumf %23, %24 : vector<1x256xf32>
    %26 = arith.cmpf oeq, %17, %25 : vector<1x256xf32>
    %27 = arith.extui %26 : vector<1x256xi1> to vector<1x256xi32>
    %28 = arith.sitofp %27 : vector<1x256xi32> to vector<1x256xf32>
    %cst = arith.constant 1.600000e+01 : f32
    %29 = vector.broadcast %cst : f32 to vector<1x256xf32>
    %30 = arith.mulf %28, %29 : vector<1x256xf32>
    %31 = vector.broadcast %30 : vector<1x256xf32> to vector<8x256xf32>
    %32 = arith.mulf %9, %31 : vector<8x256xf32>
    %33 = arith.addf %32, %0 : vector<8x256xf32>
    %34 = arith.truncf %33 : vector<8x256xf32> to vector<8x256xbf16>
    %35 = arith.extf %34 : vector<8x256xbf16> to vector<8x256xf32>
    %36 = arith.subf %33, %35 : vector<8x256xf32>
    %37 = arith.truncf %36 : vector<8x256xf32> to vector<8x256xbf16>
    %c0_11 = arith.constant 0 : index
    %c0_12 = arith.constant 0 : index
    %38 = vector.load %arg3[%c0_11, %c0_12] : memref<256x16xbf16, #tpu.memory_space<vmem>>, vector<256x16xbf16>
    %cst_13 = arith.constant dense<0.000000e+00> : vector<8x16xf32>
    %39 = tpu.matmul %34, %38, %cst_13 {dimension_numbers = #tpu.dot_dimension_numbers<[1], [0], [0], [1], [0, 0, 1, 1], [], []>} : vector<8x256xbf16>, vector<256x16xbf16>, vector<8x16xf32> -> vector<8x16xf32>
    %cst_14 = arith.constant dense<0.000000e+00> : vector<8x16xf32>
    %40 = tpu.matmul %37, %38, %cst_14 {dimension_numbers = #tpu.dot_dimension_numbers<[1], [0], [0], [1], [0, 0, 1, 1], [], []>} : vector<8x256xbf16>, vector<256x16xbf16>, vector<8x16xf32> -> vector<8x16xf32>
    %41 = arith.addf %39, %40 : vector<8x16xf32>
    %cst_15 = arith.constant 3.125000e-02 : f32
    %42 = vector.broadcast %cst_15 : f32 to vector<8x16xf32>
    %43 = arith.mulf %41, %42 : vector<8x16xf32>
    %c0_16 = arith.constant 0 : index
    %c0_17 = arith.constant 0 : index
    %44 = vector.load %arg5[%c0_16, %c0_17] : memref<8x16xf32, #tpu.memory_space<vmem>>, vector<8x16xf32>
    tpu.vector_store %arg5[%c0_16, %c0_17], %43 {strides = array<i32>} : memref<8x16xf32, #tpu.memory_space<vmem>>, vector<8x16xf32>,
    return
  }
  func.func @transform_0(%arg0: i32, %arg1: i32) -> (i32, i32) {
    %c0_i32 = arith.constant 0 : i32
    return %arg0, %arg1 : i32, i32
  }
  func.func @transform_1(%arg0: i32, %arg1: i32) -> (i32, i32) {
    %c0_i32 = arith.constant 0 : i32
    %c0_i32_0 = arith.constant 0 : i32
    %c0_i32_1 = arith.constant 0 : i32
    return %c0_i32, %c0_i32_0 : i32, i32
  }
  func.func @transform_2(%arg0: i32, %arg1: i32) -> (i32, i32) {
    %c0_i32 = arith.constant 0 : i32
    %c0_i32_0 = arith.constant 0 : i32
    %c0_i32_1 = arith.constant 0 : i32
    return %c0_i32, %c0_i32_0 : i32, i32
  }
  func.func @transform_3(%arg0: i32, %arg1: i32) -> (i32, i32) {
    %c0_i32 = arith.constant 0 : i32
    return %arg0, %arg1 : i32, i32
  }
}

</mosaic_0001>

<bundles_post_ra>
// kernel: patch_embed_pool.1
= control target key start
LH: loop header
LB: loop body
LE: loop exit
PB: predicated region body
PF: predicated region fallthrough
CT: control target
= control target key end

     0   :  { %s476_s16 = smov 127   ;;  %v21_v5 = vlaneseq  ;;  %vm69_vm1 = vcmask 1040384   ;;  %s479_s19 = smov 96   ;;  %vm384_vm6 = vcmask 130048   ;;  %s646_s2 = inlined_call_operand.vmem [shape: f32[1,256], index: 2, kind: input, shape index: {}]   ;;  %s647_s0 = inlined_call_operand.vmem [shape: f32[8,256], index: 0, kind: input, shape index: {}]   ;;  %s648_s1 = inlined_call_operand.vmem [shape: bf16[256,16], index: 1, kind: input, shape index: {}]   ;;  %s649_s3 = inlined_call_operand.vmem [shape: f32[8,16], index: 3, kind: output, shape index: {}]  }
   0x1   :  { %v16_v0 = vld [vmem:[%s646_s2] sm:$0x3]  ;;  %v513_v3 = vld [vmem:[%s647_s0 + $0x8] sm:$0xff]  ;;  %s478_s2 = smov 112  }
   0x2   :  { %v507_v1 = vld [vmem:[%s647_s0] sm:$0xff]  ;;  %v56_v2 = vperm.slane %v16_v0, 0  ;;  %v57_v4 = vperm.slane %v16_v0, 1  ;;  %v516_v7 = vand.u32 127, %v21_v5  ;;  %s477_s0 = smov 126  }
   0x3   :  { %17 = vrot.lane.b32.xlu1 %v507_v1, %s476_s16 }
   0x4   :  { %60 = vrot.lane.b32.xlu0 %v56_v2, %s476_s16  ;;  %vm23_vm0 = vcmp.lt.s32.totalorder %v516_v7, 127  ;;  %vm32_vm2 = vcmp.lt.s32.totalorder %v516_v7, 126  ;;  %vm41_vm3 = vcmp.lt.s32.totalorder %v516_v7, 112  ;;  %vm50_vm4 = vcmp.lt.s32.totalorder %v516_v7, 96 }
   0xb   :  { %19 = vrot.lane.b32.xlu1 %v513_v3, %s476_s16 }
   0xc   :  { %62 = vrot.lane.b32.xlu0 %v57_v4, %s476_s16 }
  0x75   :  { %v18_v8 = vpop.permute.xlu1 %17 }
  0x76   :  { %v61_v6 = vpop.permute.xlu0 %60 }
  0x7d   :  { %v20_v19 = vpop.permute.xlu1 %19 }
  0x7e   :  { %v63_v9 = vpop.permute.xlu0 %62  ;;  %v25_v20 = vsel %vm23_vm0, %v20_v19, %v18_v8  ;;  %v24_v23 = vsel %vm23_vm0, %v18_v8, %v20_v19  ;;  %v467_v19 = vld [vmem:[%s648_s1 + $0x60] sm:$0xff] }
  0x7f   :  { %v65_v10 = vsel %vm23_vm0, %v63_v9, %v61_v6  ;;  %v64_v12 = vsel %vm23_vm0, %v61_v6, %v63_v9  ;;  %v27_v21 = vmax.f32 %v513_v3, %v25_v20  ;;  %v26_v24 = vmax.f32 %v507_v1, %v24_v23  ;;  %v458_v20 = vld [vmem:[%s648_s1 + $0x18] sm:$0xff]  ;;  %v465_v23 = vld [vmem:[%s648_s1 + $0x50] sm:$0xff] }
  0x80   :  { %v68_v11 = vrot.slane %v65_v10, 7 }
  0x82   :  { %v70_v13 = vsel %vm69_vm1, %v64_v12, %v68_v11  ;;  %v462_v12 = vld [vmem:[%s648_s1 + $0x38] sm:$0xff] }
  0x83   :  { %v72_v14 = vmax.f32 %v16_v0, %v70_v13  ;;  %v124_v15 = vmin.f32 %v16_v0, %v70_v13  ;;  %v470_v13 = vld [vmem:[%s648_s1 + $0x78] sm:$0xff]  ;;  %357 = vmatpush.bf16.msra.mxu2 %v462_v12  ;;  %324 = vmatpush.bf16.msra.mxu0 %v462_v12 }
  0x84   :  { %370 = vmatpush.bf16.msra.mxu3 %v470_v13  ;;  %337 = vmatpush.bf16.msra.mxu1 %v470_v13 }
  0x85   :  { %v126_v16 = vperm.slane %v124_v15, 0  ;;  %v74_v17 = vperm.slane %v72_v14, 0  ;;  %v127_v18 = vperm.slane %v124_v15, 1  ;;  %v75_v22 = vperm.slane %v72_v14, 1 }
  0x87   :  { %130 = vrot.lane.b32.xlu0 %v126_v16, %s477_s0  ;;  %78 = vrot.lane.b32.xlu2 %v74_v17, %s477_s0  ;;  %v460_v16 = vld [vmem:[%s648_s1 + $0x28] sm:$0xff] }
  0x88   :  { %132 = vrot.lane.b32.xlu1 %v127_v18, %s477_s0  ;;  %v468_v17 = vld [vmem:[%s648_s1 + $0x68] sm:$0xff]  ;;  %v459_v18 = vld [vmem:[%s648_s1 + $0x20] sm:$0xff] }
  0x8f   :  { %80 = vrot.lane.b32.xlu2 %v75_v22, %s477_s0  ;;  %30 = vrot.lane.b32.xlu0 %v27_v21, %s477_s0  ;;  %v457_v22 = vld [vmem:[%s648_s1 + $0x10] sm:$0xff] }
  0x97   :  { %28 = vrot.lane.b32.xlu2 %v26_v24, %s477_s0 }
  0xe1   :  { %v79_v25 = vpop.permute.xlu2 %78 }
  0xe9   :  { %v81_v26 = vpop.permute.xlu2 %80 }
  0xea   :  { %v83_v27 = vsel %vm32_vm2, %v81_v26, %v79_v25  ;;  %v82_v29 = vsel %vm32_vm2, %v79_v25, %v81_v26  ;;  %v464_v25 = vld [vmem:[%s648_s1 + $0x48] sm:$0xff]  ;;  %v455_v26 = vld [vmem:[%s648_s1] sm:$0xff] }
  0xeb   :  { %v86_v28 = vrot.slane %v83_v27, 7  ;;  %v463_v27 = vld [vmem:[%s648_s1 + $0x40] sm:$0xff] }
  0xed   :  { %v87_v30 = vsel %vm69_vm1, %v82_v29, %v86_v28 }
  0xee   :  { %v89_v31 = vmax.f32 %v72_v14, %v87_v30  ;;  %v461_v14 = vld [vmem:[%s648_s1 + $0x30] sm:$0xff] }
  0xef   :  { %358 = vmatpush.bf16.msra.mxu2 %v461_v14  ;;  %325 = vmatpush.bf16.msra.mxu0 %v461_v14 }
  0xf0   :  { %v91_v32 = vperm.slane %v89_v31, 0  ;;  %v92_v33 = vperm.slane %v89_v31, 1 }
  0xf1   :  { %v29_v41 = vpop.permute.xlu2 %28 }
  0xf2   :  { %95 = vrot.lane.b32.xlu1 %v91_v32, %s478_s2  ;;  %97 = vrot.lane.b32.xlu2 %v92_v33, %s478_s2 }
  0xf3   :  { %359 = vmatpush.bf16.msra.mxu2 %v460_v16  ;;  %326 = vmatpush.bf16.msra.mxu0 %v460_v16 }
  0xf7   :  { %360 = vmatpush.bf16.msra.mxu2 %v459_v18  ;;  %327 = vmatpush.bf16.msra.mxu0 %v459_v18 }
  0xf9   :  { %v131_v34 = vpop.permute.xlu0 %130 }
  0xfa   :  { %v133_v35 = vpop.permute.xlu1 %132 }
  0xfb   :  { %v135_v36 = vsel %vm32_vm2, %v133_v35, %v131_v34  ;;  %v134_v38 = vsel %vm32_vm2, %v131_v34, %v133_v35  ;;  %361 = vmatpush.bf16.msra.mxu2 %v458_v20  ;;  %328 = vmatpush.bf16.msra.mxu0 %v458_v20 }
  0xfc   :  { %v138_v37 = vrot.slane %v135_v36, 7 }
  0xfe   :  { %v139_v39 = vsel %vm69_vm1, %v134_v38, %v138_v37 }
  0xff   :  { %v141_v40 = vmin.f32 %v124_v15, %v139_v39  ;;  %v469_v15 = vld [vmem:[%s648_s1 + $0x70] sm:$0xff]  ;;  %362 = vmatpush.bf16.msra.mxu2 %v457_v22  ;;  %329 = vmatpush.bf16.msra.mxu0 %v457_v22 }
 0x100   :  { %371 = vmatpush.bf16.msra.mxu3 %v469_v15  ;;  %338 = vmatpush.bf16.msra.mxu1 %v469_v15 }
 0x101   :  { %v31_v42 = vpop.permute.xlu0 %30  ;;  %v144_v43 = vperm.slane %v141_v40, 1  ;;  %v143_v44 = vperm.slane %v141_v40, 0 }
 0x102   :  { %v33_v45 = vsel %vm32_vm2, %v29_v41, %v31_v42  ;;  %v34_v47 = vsel %vm32_vm2, %v31_v42, %v29_v41 }
 0x103   :  { %v35_v46 = vmax.f32 %v26_v24, %v33_v45  ;;  %149 = vrot.lane.b32.xlu1 %v144_v43, %s478_s2  ;;  %147 = vrot.lane.b32.xlu0 %v143_v44, %s478_s2  ;;  %v36_v48 = vmax.f32 %v27_v21, %v34_v47  ;;  %v466_v21 = vld [vmem:[%s648_s1 + $0x58] sm:$0xff]  ;;  %v456_v24 = vld [vmem:[%s648_s1 + $0x8] sm:$0xff]  ;;  %v480_v43 = vmov 0.0  }
 0x104   :  { %372 = vmatpush.bf16.msra.mxu3 %v468_v17  ;;  %339 = vmatpush.bf16.msra.mxu1 %v468_v17 }
 0x105   :  { %37 = vrot.lane.b32.xlu2 %v35_v46, %s478_s2  ;;  %363 = vmatpush.bf16.msra.mxu2 %v456_v24 }
 0x106   :  { %330 = vmatpush.bf16.msra.mxu0 %v456_v24 }
 0x108   :  { %373 = vmatpush.bf16.msra.mxu3 %v467_v19  ;;  %340 = vmatpush.bf16.msra.mxu1 %v467_v19 }
 0x109   :  { %364 = vmatpush.bf16.msra.mxu2 %v455_v26 }
 0x10a   :  { %331 = vmatpush.bf16.msra.mxu0 %v455_v26 }
 0x10b   :  { %39 = vrot.lane.b32.xlu0 %v36_v48, %s478_s2 }
 0x10c   :  { %374 = vmatpush.bf16.msra.mxu3 %v466_v21  ;;  %341 = vmatpush.bf16.msra.mxu1 %v466_v21 }
 0x110   :  { %375 = vmatpush.bf16.msra.mxu3 %v465_v23  ;;  %342 = vmatpush.bf16.msra.mxu1 %v465_v23 }
 0x114   :  { %376 = vmatpush.bf16.msra.mxu3 %v464_v25  ;;  %343 = vmatpush.bf16.msra.mxu1 %v464_v25 }
 0x118   :  { %377 = vmatpush.bf16.msra.mxu3 %v463_v27  ;;  %344 = vmatpush.bf16.msra.mxu1 %v463_v27 }
 0x14c   :  { %v98_v49 = vpop.permute.xlu2 %97 }
 0x15f   :  { %v38_v5 = vpop.permute.xlu2 %37 }
 0x164   :  { %v96_v50 = vpop.permute.xlu1 %95 }
 0x165   :  { %v100_v51 = vsel %vm41_vm3, %v98_v49, %v96_v50  ;;  %v99_v53 = vsel %vm41_vm3, %v96_v50, %v98_v49 }
 0x166   :  { %v103_v52 = vrot.slane %v100_v51, 7 }
 0x168   :  { %v104_v54 = vsel %vm69_vm1, %v99_v53, %v103_v52 }
 0x169   :  { %v551_v55 = vmax.f32 %v89_v31, %v104_v54 }
 0x16b   :  { %v109_v56 = vperm.slane %v551_v55, 1  ;;  %v108_v57 = vperm.slane %v551_v55, 0 }
 0x16d   :  { %114 = vrot.lane.b32.xlu2 %v109_v56, %s479_s19  ;;  %112 = vrot.lane.b32.xlu1 %v108_v57, %s479_s19 }
 0x175   :  { %v148_v58 = vpop.permute.xlu0 %147  ;;  %v150_v59 = vpop.permute.xlu1 %149 }
 0x176   :  { %v152_v60 = vsel %vm41_vm3, %v150_v59, %v148_v58  ;;  %v151_v62 = vsel %vm41_vm3, %v148_v58, %v150_v59 }
 0x177   :  { %v155_v61 = vrot.slane %v152_v60, 7 }
 0x179   :  { %v156_v63 = vsel %vm69_vm1, %v151_v62, %v155_v61 }
 0x17a   :  { %v560_v0 = vmin.f32 %v141_v40, %v156_v63 }
 0x17c   :  { %v161_v2 = vperm.slane %v560_v0, 1  ;;  %v160_v4 = vperm.slane %v560_v0, 0 }
 0x17d   :  { %v40_v6 = vpop.permute.xlu0 %39 }
 0x17e   :  { %v42_v8 = vsel %vm41_vm3, %v38_v5, %v40_v6  ;;  %166 = vrot.lane.b32.xlu1 %v161_v2, %s479_s19  ;;  %164 = vrot.lane.b32.xlu0 %v160_v4, %s479_s19  ;;  %v43_v10 = vsel %vm41_vm3, %v40_v6, %v38_v5 }
 0x17f   :  { %v566_v9 = vmax.f32 %v35_v46, %v42_v8  ;;  %v571_v11 = vmax.f32 %v36_v48, %v43_v10 }
 0x181   :  { %46 = vrot.lane.b32.xlu2 %v566_v9, %s479_s19 }
 0x186   :  { %48 = vrot.lane.b32.xlu0 %v571_v11, %s479_s19 }
 0x1c7   :  { %v115_v29 = vpop.permute.xlu2 %114 }
 0x1db   :  { %v47_v42 = vpop.permute.xlu2 %46 }
 0x1df   :  { %v113_v28 = vpop.permute.xlu1 %112 }
 0x1e0   :  { %v117_v30 = vsel %vm50_vm4, %v115_v29, %v113_v28  ;;  %v116_v34 = vsel %vm50_vm4, %v113_v28, %v115_v29 }
 0x1e1   :  { %v120_v31 = vrot.slane %v117_v30, 7 }
 0x1e3   :  { %v121_v36 = vsel %vm69_vm1, %v116_v34, %v120_v31 }
 0x1e4   :  { %v123_v40 = vmax.f32 %v551_v55, %v121_v36 }
 0x1f0   :  { %v165_v32 = vpop.permute.xlu0 %164  ;;  %v167_v33 = vpop.permute.xlu1 %166 }
 0x1f1   :  { %v169_v35 = vsel %vm50_vm4, %v167_v33, %v165_v32  ;;  %v168_v38 = vsel %vm50_vm4, %v165_v32, %v167_v33 }
 0x1f2   :  { %v172_v37 = vrot.slane %v169_v35, 7 }
 0x1f4   :  { %v173_v39 = vsel %vm69_vm1, %v168_v38, %v172_v37 }
 0x1f5   :  { %v175_v41 = vmin.f32 %v560_v0, %v173_v39 }
 0x1f7   :  { %vm176_vm5 = vcmp.eq.f32.partialorder %v123_v40, %v175_v41 }
 0x1f8   :  { %v390_v44 = vsel %vm176_vm5, 1.0, %v480_v43  ;;  %v49_v45 = vpop.permute.xlu0 %48 }
 0x1f9   :  { %v179_v46 = vmul.f32 16.0, %v390_v44  ;;  %v51_v47 = vsel %vm50_vm4, %v47_v42, %v49_v45  ;;  %v52_v48 = vsel %vm50_vm4, %v49_v45, %v47_v42 }
 0x1fa   :  { %v53_v49 = vmax.f32 %v566_v9, %v51_v47  ;;  %v54_v50 = vmax.f32 %v571_v11, %v52_v48 }
 0x1fb   :  { %v181_v51 = vperm.slane %v179_v46, 0  ;;  %v182_v52 = vperm.slane %v179_v46, 1 }
 0x1fd   :  { %v185_v53 = vmul.f32 %v181_v51, %v53_v49  ;;  %v186_v54 = vmul.f32 %v182_v52, %v54_v50 }
 0x1ff   :  { %v187_v55 = vadd.f32 %v185_v53, %v507_v1  ;;  %v188_v56 = vadd.f32 %v186_v54, %v513_v3 }
 0x201   :  { %v189_v57 = vpack.c.bf16 %v188_v56, %v187_v55 }
 0x203   :  { %v351_v58 = vunpack.c.l.b16 %v189_v57  ;;  %v352_v59 = vunpack.c.h.b16 %v189_v57  ;;  %v190_v60 = vunpack.c.l.bf16 %v189_v57  ;;  %v191_v61 = vunpack.c.h.bf16 %v189_v57 }
 0x205   :  { %v353_v62 = vpack.c.b16 %v351_v58, %v351_v58  ;;  %v354_v7 = vpack.c.b16 %v352_v59, %v352_v59  ;;  %v192_v63 = vsub.f32 %v187_v55, %v190_v60  ;;  %v193_v0 = vsub.f32 %v188_v56, %v191_v61 }
 0x207   :  { %365 = vmatmul.bf16.vlgmr.msra.gmra.mxu2 %v353_v62  ;;  %378 = vmatmul.bf16.vlgmr.msra.gmra.mxu3 %v354_v7  ;;  %v194_v2 = vpack.c.bf16 %v192_v63, %v192_v63  ;;  %v195_v4 = vpack.c.bf16 %v193_v0, %v193_v0 }
 0x209   :  { %332 = vmatmul.bf16.vlgmr.msra.gmra.mxu0 %v194_v2  ;;  %345 = vmatmul.bf16.vlgmr.msra.gmra.mxu1 %v195_v4 }
 0x286   :  { %v333_v5 = vpop.f32.mrf.mxu0  ;;  %v346_v6 = vpop.f32.mrf.mxu1 }
 0x287   :  { %v347_v1 = vadd.f32 %v346_v6, %v333_v5 }
 0x28a   :  { %v366_v8 = vpop.f32.mrf.mxu2  ;;  %v379_v3 = vpop.f32.mrf.mxu3 }
 0x28b   :  { %v367_v9 = vadd.f32 %v366_v8, %v347_v1 }
 0x28d   :  { %v380_v10 = vadd.f32 %v379_v3, %v367_v9 }
 0x28e   :  { %v335_v11 = vpop.f32.mrf.mxu0  ;;  %v348_v12 = vpop.f32.mrf.mxu1 }
 0x28f   :  { %v383_v13 = vmul.f32 0.03125, %v380_v10 }
 0x291   :  { %385 = vst.msk [vmem:[%s649_s3] sm:$0xff] %vm384_vm6, %v383_v13 }
 0x292   :  { %v368_v14 = vpop.f32.mrf.mxu2  ;;  %v381_v15 = vpop.f32.mrf.mxu3 }

</bundles_post_ra>
